<compile_context>
chip_gen: v5e
topology: v5e:2x2
jax: 0.10.0
libtpu: 0.0.40
codegen_flags: <defaults>
</compile_context>

<pallas_src>
import jax
import jax.numpy as jnp
from jax.experimental import pallas as pl
from jax.experimental.pallas import tpu as pltpu


def _linear_kernel(x_ref, w_ref, b_ref, o_ref):
    # x_ref: (B, emb)  w_ref: (out, emb)  b_ref: (1, out)  o_ref: (B, out)
    # Contract emb (dim 1 of x) against emb (dim 1 of w): y = x @ w.T
    acc = jax.lax.dot_general(
        x_ref[...], w_ref[...],
        dimension_numbers=(((1,), (1,)), ((), ())),
        preferred_element_type=jnp.float32,
    )
    o_ref[...] = (acc + b_ref[...]).astype(o_ref.dtype)


def lnet_forward(x, weight, bias):
    """y = x @ weight.T + bias  (nn.Linear semantics).

    x:      (B, emb)   float32
    weight: (out, emb) float32   (PyTorch layout, used untransposed)
    bias:   (out,)     float32
    returns (B, out)   float32
    """
    B, emb = x.shape
    out_size = weight.shape[0]
    b2d = bias.reshape(1, out_size)   # 2-D for TPU vreg layout

    # Gridless call: whole arrays resident in VMEM, no pipeline prologue/epilogue.
    return pl.pallas_call(
        _linear_kernel,
        out_shape=jax.ShapeDtypeStruct((B, out_size), x.dtype),
        in_specs=[
            pl.BlockSpec(memory_space=pltpu.MemorySpace.VMEM),  # x
            pl.BlockSpec(memory_space=pltpu.MemorySpace.VMEM),  # weight (out, emb)
            pl.BlockSpec(memory_space=pltpu.MemorySpace.VMEM),  # bias (1, out)
        ],
        out_specs=pl.BlockSpec(memory_space=pltpu.MemorySpace.VMEM),
    )(x, weight, b2d)


if __name__ == "__main__":
    emb_size = 256
    out_size = 8     # AET-style output head (e.g. projective transform params)
    batch = 8

    key = jax.random.PRNGKey(0)
    kx, kw, kb = jax.random.split(key, 3)

    # Deterministic parameter init, mimicking PyTorch Linear default
    # (U(-k, k), k = 1/sqrt(emb)).
    bound = 1.0 / jnp.sqrt(jnp.float32(emb_size))
    weight = jax.random.uniform(kw, (out_size, emb_size), jnp.float32, -bound, bound)
    bias = jax.random.uniform(kb, (out_size,), jnp.float32, -bound, bound)

    x = jax.random.normal(kx, (batch, emb_size), jnp.float32)

    y = lnet_forward(x, weight, bias)
    jax.block_until_ready(y)

    # Reference check against plain JAX (same math as torch Linear).
    y_ref = x @ weight.T + bias
    assert y.shape == (batch, out_size)
    assert jnp.allclose(y, y_ref, atol=1e-5, rtol=1e-5)

    print("KERNEL_OK")
</pallas_src>

<mosaic_0001>
module attributes {stable_mosaic.version = 11 : i64} {
  func.func @_linear_kernel(%arg0: memref<8x256xf32, #tpu.memory_space<vmem>>, %arg1: memref<8x256xf32, #tpu.memory_space<vmem>>, %arg2: memref<1x8xf32, #tpu.memory_space<vmem>>, %arg3: memref<8x8xf32, #tpu.memory_space<vmem>>) attributes {dimension_semantics = [], scalar_prefetch = 0 : i64, scratch_operands = 0 : i64, tpu.core_type = #tpu.core_type<tc>} {
    %c0 = arith.constant 0 : index
    %c0_0 = arith.constant 0 : index
    %0 = vector.load %arg0[%c0, %c0_0] : memref<8x256xf32, #tpu.memory_space<vmem>>, vector<8x256xf32>
    %c0_1 = arith.constant 0 : index
    %c0_2 = arith.constant 0 : index
    %1 = vector.load %arg1[%c0_1, %c0_2] : memref<8x256xf32, #tpu.memory_space<vmem>>, vector<8x256xf32>
    %cst = arith.constant dense<0.000000e+00> : vector<8x8xf32>
    %2 = tpu.matmul %0, %1, %cst {dimension_numbers = #tpu.dot_dimension_numbers<[1], [1], [0], [0], [0, 0, 1, 0], [], []>} : vector<8x256xf32>, vector<8x256xf32>, vector<8x8xf32> -> vector<8x8xf32>
    %c0_3 = arith.constant 0 : index
    %c0_4 = arith.constant 0 : index
    %3 = vector.load %arg2[%c0_3, %c0_4] : memref<1x8xf32, #tpu.memory_space<vmem>>, vector<1x8xf32>
    %4 = vector.broadcast %3 : vector<1x8xf32> to vector<8x8xf32>
    %5 = arith.addf %2, %4 : vector<8x8xf32>
    %c0_5 = arith.constant 0 : index
    %c0_6 = arith.constant 0 : index
    %6 = vector.load %arg3[%c0_5, %c0_6] : memref<8x8xf32, #tpu.memory_space<vmem>>, vector<8x8xf32>
    tpu.vector_store %arg3[%c0_5, %c0_6], %5 {strides = array<i32>} : memref<8x8xf32, #tpu.memory_space<vmem>>, vector<8x8xf32>,
    return
  }
}

</mosaic_0001>

<bundles_post_ra>
// kernel: tpu_custom_call.1
= control target key start
LH: loop header
LB: loop body
LE: loop exit
PB: predicated region body
PF: predicated region fallthrough
CT: control target
= control target key end

     0   :  { %8 = vsyncpa [#allocation3], 0  ;;  %s228_s0 = inlined_call_operand.hbm [shape: f32[8,256], index: 0, kind: input, shape index: {}]   ;;  %s229_s1 = inlined_call_operand.hbm [shape: f32[8,256], index: 1, kind: input, shape index: {}]   ;;  %s230_s2 = inlined_call_operand.vmem [shape: f32[1,8], index: 2, kind: input, shape index: {}]   ;;  %s231_s3 = inlined_call_operand.hbm [shape: f32[8,8], index: 3, kind: output, shape index: {}]  }
   0x1   :  { %9 = vsyncpa [#allocation6], 0 }
   0x2   :  { %10 = vsyncpa [#allocation4], 0  ;;  %s16_s14 = sshll.u32 %s228_s0, 4  ;;  %s193_s15 = smov [#allocation2]   ;;  %s17_s14 = int_to_ptr.hbm [resolvable:$true] %s16_s14 }
   0x3   :  { %s18_s16 = sshll.u32 %s193_s15, 4  ;;  %s27_s19 = sshll.u32 %s229_s1, 4  ;;  %s19_s16 = int_to_ptr.vmem [resolvable:$true] %s18_s16  ;;  %s28_s19 = int_to_ptr.hbm [resolvable:$true] %s27_s19 }
   0x4   :  { %21 = dma.hbm_to_vmem [thread:$0]  %s17_s14, 256, %s19_s16, [#allocation3]  }
   0x5   :  { %s194_s20 = smov [#allocation5]  }
   0x6   :  { %s29_s21 = sshll.u32 %s194_s20, 4  ;;  %s30_s21 = int_to_ptr.vmem [resolvable:$true] %s29_s21 }
   0x7   :  { %32 = dma.hbm_to_vmem [thread:$0]  %s28_s19, 256, %s30_s21, [#allocation6]  }
   0x8   :  { %187 = dma.done.wait [#allocation3], 256  }
   0x9   :  { %188 = vsyncadd [#allocation3], 4294967040 }
   0xa   :  { %189 = dma.done.wait [#allocation6], 256  }
   0xb   :  { %190 = vsyncadd [#allocation6], 4294967040  ;;  %v45_v0 = vld [vmem:[#allocation5] sm:$0xff]  ;;  %v46_v1 = vld [vmem:[#allocation5 + $0x8] sm:$0xff]  ;;  %s195_s22 = smov [#allocation7]   ;;  %s100_s26 = sshll.u32 %s231_s3, 4  ;;  %s101_s26 = int_to_ptr.hbm [resolvable:$true] %s100_s26 }
   0xc   :  { %66 = vmatpush.xpose.msra.mxu0 %v45_v0  ;;  %86 = vmatpush.xpose.msra.mxu1 %v46_v1  ;;  %v43_v2 = vld [vmem:[#allocation2] sm:$0xff]  ;;  %v44_v3 = vld [vmem:[#allocation2 + $0x8] sm:$0xff]  ;;  %s98_s23 = sshll.u32 %s195_s22, 4  ;;  %vm91_vm0 = vcmask 64512   ;;  %s99_s23 = int_to_ptr.vmem [resolvable:$true] %s98_s23 }
   0xd   :  { %v114_v4 = vld [vmem:[%s230_s2] ss:$0 sm:$0xff] }
   0xf   :  { %67 = vmatmul.f32.vlgmr.msra.gmra.mxu0 %v43_v2  ;;  %87 = vmatmul.f32.vlgmr.msra.gmra.mxu1 %v44_v3 }
  0x8c   :  { %v68_v5 = vpop.f32.mrf.mxu0  ;;  %v88_v6 = vpop.f32.mrf.mxu1 }
  0x8d   :  { %v69_v7 = vadd.f32 %v114_v4, %v68_v5 }
  0x8f   :  { %v89_v8 = vadd.f32 %v88_v6, %v69_v7 }
  0x91   :  { %92 = vst.msk [vmem:[#allocation7] sm:$0xff] %vm91_vm0, %v89_v8 }
  0x92   :  { %103 = dma.vmem_to_hbm [thread:$0]  %s99_s23, 128, %s101_s26, [#allocation4]  }
  0x93   :  { %191 = dma.done.wait [#allocation4], 128  }
  0x94   :  { %192 = vsyncadd [#allocation4], 4294967168 }
  0x95   :  { %108 = vsyncpa [#allocation3], 1 }
  0x96   :  { %109 = vsyncpa [#allocation6], 1 }
  0x97   :  { %110 = vsyncpa [#allocation4], 1 }

</bundles_post_ra>
